<compile_context>
chip_gen: v5e
topology: v5e:2x2
jax: 0.10.0
libtpu: 0.0.40
codegen_flags: <defaults>
</compile_context>

<pallas_src>
import jax
import jax.numpy as jnp
from jax.experimental import pallas as pl
from jax.experimental.pallas import tpu as pltpu


def _round_up(x, m):
    return (x + m - 1) // m * m


def _vmem_budget_bytes():
    """Generation-aware VMEM budget (~75% of physical VMEM)."""
    try:
        cap = pltpu.get_tpu_info().vmem_capacity_bytes
    except Exception:
        cap = 64 * 1024 * 1024          # conservative fallback (v7x per-TC VMEM)
    return int(cap) * 3 // 4            # ~48 MiB on v7x, ~96 MiB on v5e/v6e


def _divisor_tiles(total_pad):
    """All lane-dense (multiple-of-128) tile sizes that evenly divide total_pad."""
    m = total_pad // 128
    return sorted(128 * d for d in range(1, m + 1) if m % d == 0)


def _choose_tiles(B_pad, K_pad, N_pad, tn_max, tk_max, budget):
    def working_set(tk, tn):
        return (2 * tk * tn * 2          # double-buffered bf16 W tile
                + B_pad * K_pad * 2      # x pinned fully in VMEM (bf16)
                + 2 * B_pad * tn * 4     # double-buffered fp32 output tile
                + 2 * tn * (2 + 4))      # bias (bf16) + eos (fp32) rows

    n_divs = _divisor_tiles(N_pad)
    # Keep >= 2 "parallel" N tiles when possible (v7x megacore); harmless on 1-TC parts.
    cands = [t for t in n_divs if t <= tn_max and N_pad // t >= 2]
    if not cands:
        cands = [t for t in n_divs if t <= tn_max] or [n_divs[0]]
    tn = max(cands)

    # Fast path: collapse K entirely (no accumulator / branches) if it fits.
    if K_pad <= tk_max and working_set(K_pad, tn) <= budget:
        return tn, K_pad
    k_cands = [t for t in _divisor_tiles(K_pad) if t <= tk_max]
    for tk in sorted(k_cands, reverse=True):
        if working_set(tk, tn) <= budget:
            return tn, tk
    return tn, 128


# ----------------------------------------------------------------------------
# Kernels.  y = f32(bf16(x @ W + b)) + eos_row   (eos columns have zero W / b)
# ----------------------------------------------------------------------------
def _proj_eos_single_k_kernel(x_ref, w_ref, b_ref, eos_ref, o_ref):
    # One K step: matmul + bias + bf16 rounding + fp32 eos add, no accumulator.
    y = jnp.dot(x_ref[...], w_ref[...], preferred_element_type=jnp.float32)
    y = y + b_ref[...].astype(jnp.float32)
    y = y.astype(jnp.bfloat16).astype(jnp.float32)   # torch bf16 Linear rounding
    o_ref[...] = y + eos_ref[...]                    # exact fp32 eos columns


def _proj_eos_multi_k_kernel(x_ref, w_ref, b_ref, eos_ref, o_ref):
    # x is pinned fully in VMEM; only W streams along K.  The fp32 output tile
    # has a k-invariant block index (VMEM-resident) and doubles as accumulator.
    k = pl.program_id(1)
    tk = w_ref.shape[0]
    start = pl.multiple_of(k * tk, 128)
    part = jnp.dot(x_ref[:, pl.ds(start, tk)], w_ref[...],
                   preferred_element_type=jnp.float32)

    @pl.when(k == 0)
    def _():
        o_ref[...] = part

    @pl.when(k != 0)
    def _():
        o_ref[...] += part

    @pl.when(k == pl.num_programs(1) - 1)
    def _():
        y = o_ref[...] + b_ref[...].astype(jnp.float32)
        y = y.astype(jnp.bfloat16).astype(jnp.float32)
        o_ref[...] = y + eos_ref[...]


# ----------------------------------------------------------------------------
# Parameter-init-time padding (done ONCE, cached, reused every forward call).
# ----------------------------------------------------------------------------
def prepare_linear_eos_params(w_t, b, eos, prompt_length, output_dim):
    """Pad weight / bias / eos to hardware minima (multiples of 128).

    w_t : [input_dim, prompt_length*output_dim]  (torch nn.Linear weight, transposed)
    b   : [prompt_length*output_dim]
    eos : [output_dim] fp32
    """
    H, PD = w_t.shape
    D = output_dim
    assert PD == prompt_length * D
    NN = PD + D                                   # flattened (P+1)*D output width
    K_pad = _round_up(H, 128)
    N_pad = _round_up(NN, 128)

    w_p = jnp.zeros((K_pad, N_pad), jnp.bfloat16).at[:H, :PD].set(
        w_t.astype(jnp.bfloat16))
    b_p = jnp.zeros((1, N_pad), jnp.bfloat16).at[0, :PD].set(
        b.astype(jnp.bfloat16))
    eos_p = jnp.zeros((1, N_pad), jnp.float32).at[0, PD:PD + D].set(
        eos.astype(jnp.float32))

    return dict(w_p=w_p, b_p=b_p, eos_p=eos_p, input_dim=H,
                K_pad=K_pad, N_pad=N_pad, NN=NN,
                prompt_length=prompt_length, output_dim=D)


# ----------------------------------------------------------------------------
# Forward.
# ----------------------------------------------------------------------------
def linear_with_added_eos(paragraphs, params, *, tn_max=2048, tk_max=2048):
    """LinearWithAddedEos.forward (use_eos=True) on pre-padded parameters.

    paragraphs : [B, input_dim]   (cast to bf16, as the torch caller must)
    returns    : [B, P+1, D] fp32
    """
    B, H = paragraphs.shape
    assert H == params["input_dim"]
    K_pad, N_pad, NN = params["K_pad"], params["N_pad"], params["NN"]
    P, D = params["prompt_length"], params["output_dim"]
    w_p, b_p, eos_p = params["w_p"], params["b_p"], params["eos_p"]

    B_pad = _round_up(B, 8)
    budget = _vmem_budget_bytes()
    tn, tk = _choose_tiles(B_pad, K_pad, N_pad, tn_max, tk_max, budget)
    n_tiles, k_tiles = N_pad // tn, K_pad // tk

    # Only the (tiny) activation is padded per call; parameter padding is cached.
    x_p = jnp.zeros((B_pad, K_pad), jnp.bfloat16).at[:B, :H].set(
        paragraphs.astype(jnp.bfloat16))

    cost = pl.CostEstimate(
        flops=2 * B_pad * K_pad * N_pad,
        transcendentals=0,
        bytes_accessed=(w_p.size * 2 + x_p.size * 2 + b_p.size * 2
                        + eos_p.size * 4 + B_pad * N_pad * 4))

    if k_tiles == 1:
        grid = (n_tiles,)
        in_specs = [
            pl.BlockSpec((B_pad, K_pad), lambda j: (0, 0)),   # x, pinned in VMEM
            pl.BlockSpec((K_pad, tn),    lambda j: (0, j)),   # full-K W stripe
            pl.BlockSpec((1, tn),        lambda j: (0, j)),   # bias row
            pl.BlockSpec((1, tn),        lambda j: (0, j)),   # eos row
        ]
        out_spec = pl.BlockSpec((B_pad, tn), lambda j: (0, j))
        kernel = _proj_eos_single_k_kernel
        dims = ("parallel",)
    else:
        grid = (n_tiles, k_tiles)                             # K reduction last
        in_specs = [
            pl.BlockSpec((B_pad, K_pad), lambda j, k: (0, 0)),   # x, pinned
            pl.BlockSpec((tk, tn),       lambda j, k: (k, j)),   # W tile
            pl.BlockSpec((1, tn),        lambda j, k: (0, j)),   # bias row
            pl.BlockSpec((1, tn),        lambda j, k: (0, j)),   # eos row
        ]
        out_spec = pl.BlockSpec((B_pad, tn), lambda j, k: (0, j))
        kernel = _proj_eos_multi_k_kernel
        dims = ("parallel", "arbitrary")

    out_flat = pl.pallas_call(
        kernel,
        out_shape=jax.ShapeDtypeStruct((B_pad, N_pad), jnp.float32),
        grid_spec=pltpu.PrefetchScalarGridSpec(
            num_scalar_prefetch=0,
            grid=grid,
            in_specs=in_specs,
            out_specs=out_spec,
        ),
        compiler_params=pltpu.CompilerParams(
            dimension_semantics=dims,
            vmem_limit_bytes=budget,
        ),
        cost_estimate=cost,
    )(x_p, w_p, b_p, eos_p)

    # [B, (P+1)*D] -> [B, P+1, D] is a row-major view; slice off padding.
    return out_flat[:B, :NN].reshape(B, P + 1, D)


if __name__ == "__main__":
    # Small shapes consistent with the module's constructor arguments.
    B = 2             # batch of paragraph embeddings
    INPUT_DIM = 256   # input_dim
    OUTPUT_DIM = 64   # output_dim (decoder hidden size)
    PROMPT_LEN = 10   # prompt_length

    key = jax.random.PRNGKey(0)
    k_x, k_w, k_b, k_eos = jax.random.split(key, 4)

    paragraphs = jax.random.normal(k_x, (B, INPUT_DIM), dtype=jnp.float32).astype(jnp.bfloat16)
    w_t = (0.05 * jax.random.normal(k_w, (INPUT_DIM, PROMPT_LEN * OUTPUT_DIM))).astype(jnp.bfloat16)
    b = (0.05 * jax.random.normal(k_b, (PROMPT_LEN * OUTPUT_DIM,))).astype(jnp.bfloat16)
    eos = jax.random.normal(k_eos, (OUTPUT_DIM,), dtype=jnp.float32)   # nn.Parameter(torch.randn(D))

    # Parameter padding happens ONCE here (init time), not per forward call.
    params = prepare_linear_eos_params(w_t, b, eos, PROMPT_LEN, OUTPUT_DIM)

    # Pure-JAX reference (fp32 accumulation, bf16 output rounding, fp32 concat).
    # TODO(synk): assumes the torch bf16 Linear accumulates in fp32 (standard MXU semantics).
    proj_f32 = jnp.dot(paragraphs.astype(jnp.float32), w_t.astype(jnp.float32),
                       precision=jax.lax.Precision.HIGHEST) + b.astype(jnp.float32)
    prompts_ref = proj_f32.astype(jnp.bfloat16).reshape(
        B, PROMPT_LEN, OUTPUT_DIM).astype(jnp.float32)
    expected = jnp.concatenate(
        [prompts_ref, jnp.broadcast_to(eos[None, None, :], (B, 1, OUTPUT_DIM))], axis=1)

    # Default path: full-K stripe (single K step), >= 2 parallel N tiles.
    out = jax.block_until_ready(linear_with_added_eos(paragraphs, params))
    assert out.shape == (B, PROMPT_LEN + 1, OUTPUT_DIM), out.shape
    assert out.dtype == jnp.float32, out.dtype
    assert jnp.allclose(out, expected, atol=1e-2, rtol=1e-2), "single-K path mismatch"

    # Small-tile path: forces the multi-K accumulate-into-output kernel.
    out2 = jax.block_until_ready(
        linear_with_added_eos(paragraphs, params, tn_max=128, tk_max=128))
    assert jnp.allclose(out2, expected, atol=1e-2, rtol=1e-2), "multi-K path mismatch"

    print("KERNEL_OK")
</pallas_src>

<mosaic_0001>
module attributes {stable_mosaic.version = 11 : i64} {
  func.func @_proj_eos_single_k_kernel(%arg0: i32, %arg1: memref<8x256xbf16, #tpu.memory_space<vmem>>, %arg2: memref<256x384xbf16, #tpu.memory_space<vmem>>, %arg3: memref<1x384xbf16, #tpu.memory_space<vmem>>, %arg4: memref<1x384xf32, #tpu.memory_space<vmem>>, %arg5: memref<8x384xf32, #tpu.memory_space<vmem>>) attributes {dimension_semantics = [#tpu.dimension_semantics<parallel>], iteration_bounds = array<i64: 2>, scalar_prefetch = 0 : i64, scratch_operands = 0 : i64, tpu.core_type = #tpu.core_type<tc>, window_params = [{pipeline_mode = #tpu.pipeline_mode<synchronous>, transform_indices = @transform_0, window_bounds = array<i64: 8, 256>}, {transform_indices = @transform_1, window_bounds = array<i64: 256, 384>}, {transform_indices = @transform_2, window_bounds = array<i64: 1, 384>}, {transform_indices = @transform_3, window_bounds = array<i64: 1, 384>}, {transform_indices = @transform_4, window_bounds = array<i64: 8, 384>}]} {
    %c0 = arith.constant 0 : index
    %c0_0 = arith.constant 0 : index
    %0 = vector.load %arg1[%c0, %c0_0] : memref<8x256xbf16, #tpu.memory_space<vmem>>, vector<8x256xbf16>
    %c0_1 = arith.constant 0 : index
    %c0_2 = arith.constant 0 : index
    %1 = vector.load %arg2[%c0_1, %c0_2] : memref<256x384xbf16, #tpu.memory_space<vmem>>, vector<256x384xbf16>
    %cst = arith.constant dense<0.000000e+00> : vector<8x384xf32>
    %2 = tpu.matmul %0, %1, %cst {dimension_numbers = #tpu.dot_dimension_numbers<[1], [0], [0], [1], [0, 0, 1, 1], [], []>} : vector<8x256xbf16>, vector<256x384xbf16>, vector<8x384xf32> -> vector<8x384xf32>
    %c0_3 = arith.constant 0 : index
    %c0_4 = arith.constant 0 : index
    %3 = vector.load %arg3[%c0_3, %c0_4] : memref<1x384xbf16, #tpu.memory_space<vmem>>, vector<1x384xbf16>
    %4 = arith.extf %3 : vector<1x384xbf16> to vector<1x384xf32>
    %5 = vector.broadcast %4 : vector<1x384xf32> to vector<8x384xf32>
    %6 = arith.addf %2, %5 : vector<8x384xf32>
    %7 = arith.truncf %6 : vector<8x384xf32> to vector<8x384xbf16>
    %8 = arith.extf %7 : vector<8x384xbf16> to vector<8x384xf32>
    %c0_5 = arith.constant 0 : index
    %c0_6 = arith.constant 0 : index
    %9 = vector.load %arg4[%c0_5, %c0_6] : memref<1x384xf32, #tpu.memory_space<vmem>>, vector<1x384xf32>
    %10 = vector.broadcast %9 : vector<1x384xf32> to vector<8x384xf32>
    %11 = arith.addf %8, %10 : vector<8x384xf32>
    %c0_7 = arith.constant 0 : index
    %c0_8 = arith.constant 0 : index
    %12 = vector.load %arg5[%c0_7, %c0_8] : memref<8x384xf32, #tpu.memory_space<vmem>>, vector<8x384xf32>
    tpu.vector_store %arg5[%c0_7, %c0_8], %11 {strides = array<i32>} : memref<8x384xf32, #tpu.memory_space<vmem>>, vector<8x384xf32>,
    return
  }
  func.func @transform_0(%arg0: i32) -> (i32, i32) {
    %c0_i32 = arith.constant 0 : i32
    %c0_i32_0 = arith.constant 0 : i32
    %c0_i32_1 = arith.constant 0 : i32
    return %c0_i32, %c0_i32_0 : i32, i32
  }
  func.func @transform_1(%arg0: i32) -> (i32, i32) {
    %c0_i32 = arith.constant 0 : i32
    %c0_i32_0 = arith.constant 0 : i32
    return %c0_i32, %arg0 : i32, i32
  }
  func.func @transform_2(%arg0: i32) -> (i32, i32) {
    %c0_i32 = arith.constant 0 : i32
    %c0_i32_0 = arith.constant 0 : i32
    return %c0_i32, %arg0 : i32, i32
  }
  func.func @transform_3(%arg0: i32) -> (i32, i32) {
    %c0_i32 = arith.constant 0 : i32
    %c0_i32_0 = arith.constant 0 : i32
    return %c0_i32, %arg0 : i32, i32
  }
  func.func @transform_4(%arg0: i32) -> (i32, i32) {
    %c0_i32 = arith.constant 0 : i32
    %c0_i32_0 = arith.constant 0 : i32
    return %c0_i32, %arg0 : i32, i32
  }
}

</mosaic_0001>

<bundles_post_ra>
// kernel: tpu_custom_call.1
= control target key start
LH: loop header
LB: loop body
LE: loop exit
PB: predicated region body
PF: predicated region fallthrough
CT: control target
= control target key end

     0   :  { %s1749_s0 = inlined_call_operand.hbm [shape: bf16[8,256], index: 0, kind: input, shape index: {}]   ;;  %s1750_s1 = inlined_call_operand.hbm [shape: bf16[256,768], index: 1, kind: input, shape index: {}]   ;;  %s1751_s2 = inlined_call_operand.hbm [shape: bf16[1,768], index: 2, kind: input, shape index: {}]   ;;  %s1752_s3 = inlined_call_operand.hbm [shape: f32[1,768], index: 3, kind: input, shape index: {}]   ;;  %s1753_s4 = inlined_call_operand.hbm [shape: f32[8,768], index: 4, kind: output, shape index: {}]  }
   0x1   :  { %1755 = sst [smem:[#allocation17_spill]] %s1749_s0 }
   0x2   :  { %1756 = sst [smem:[#allocation18_spill]] %s1750_s1 }
   0x3   :  { %9 = vsyncpa [#allocation3], 0 }
   0x4   :  { %10 = vsyncpa [#allocation6], 0 }
   0x5   :  { %12 = vsyncpa [#allocation6 + $0x1], 0 }
   0x6   :  { %13 = vsyncpa [#allocation9], 0 }
   0x7   :  { %15 = vsyncpa [#allocation9 + $0x1], 0 }
   0x8   :  { %16 = vsyncpa [#allocation4], 0 }
   0x9   :  { %18 = vsyncpa [#allocation4 + $0x1], 0  ;;  %s1444_s15 = smov 0   ;;  %s1446_s16 = smov 0  }
   0xa   :  { %s1448_s17 = smov 0   ;;  %s1450_s18 = smov 0  }
   0xb LB: > { %1757 = sst [smem:[#allocation15_spill]] %s1409_s17  ;;  %s1465_s19 = sadd.s32 1, %s1413_s18   ;;  %s1413_s18 = sphi %s1450_s18, %s1771_s18   ;;  %s1409_s17 = sphi %s1448_s17, %s1768_s17   ;;  %s1405_s16 = sphi %s1446_s16, %s1770_s16   ;;  %s1401_s15 = sphi %s1444_s15, %s1769_s15  }
   0xc   : > { %s52_s20 = sadd.s32 1, %s1409_s17  ;;  %s49_s21 = ssub.s32 %s1413_s18, %s1465_s19 }
   0xd   : > { %p59_p0 = scmp.ne.s32.totalorder %s1409_s17, %s1405_s16  ;;  %p50_p1 = scmp.eq.s32.totalorder %s49_s21, 0 }
   0xe   : > { %p60_p2 = scmp.eq.s32.totalorder %s1413_s18, 0  ;;  %p1180_p4 = scmp.lt.s32.totalorder %s1413_s18, 2 }
   0xf   : > { %s1476_s22 = scalar_select %p50_p1, %s1409_s17, %s52_s20  }
  0x10   : > { %p61_p5 = por %p60_p2, %p59_p0  ;;  %s179_s23 = sand.u32 1, %s1413_s18  }
  0x11   : > { %1758 = sst [smem:[#allocation16_spill]] %s1476_s22  ;;  %s1483_s24 = sand.u32 1, %s1409_s17  }
  0x12   : > { %s1143_s25 = smul.u32 384, %s1483_s24  ;;  %p1486_p6 = pnand %p1180_p4, %p61_p5 }
  0x13   : > { %s1093_s27 = smul.u32 12, %s1413_s18  ;;  %s1760_s1 = sld [smem:[#allocation18_spill]] }
  0x14   : > { %s183_s5 = scalar_lea.vmem [#allocation5], %s1143_s25  ;;  %s1494_s8 = scalar_lea.sflag [#allocation6], %s179_s23 }
  0x15   : > { %s191_s6 = sshll.u32 %s183_s5, 4  ;;  %p1223_p8 = pneg %p1486_p6  ;;  %s192_s6 = int_to_ptr.vmem [resolvable:$true] %s191_s6 }
  0x19   : > { %s188_s30 = scalar_lea.hbm %s1760_s1, %s1093_s27  ;;  %s1226_s13 = scalar_lea.hbm %s1760_s1, 768 }
  0x1a   : > { %s189_s7 = sshll.u32 %s188_s30, 4  ;;  %s190_s7 = int_to_ptr.hbm [resolvable:$true] %s189_s7 }
  0x1b   : > { %s1219_s9 = sshra.s32 %s190_s7, 4  ;;  %s1220_s9 = int_to_ptr.hbm [resolvable:$true] %s1219_s9 }
  0x1c   : > { %s1221_s10 = scalar_lea.hbm %s1220_s9, 384  ;;  %p1227_p11 = scmp.lt.s32.totalorder %s1220_s9, %s1760_s1 }
  0x1d   : > { %p1222_p7 = scmp.ne.s32.totalorder %s1220_s9, %s1221_s10  ;;  %p1228_p12 = scmp.lt.s32.totalorder %s1226_s13, %s1221_s10 }
  0x1f   : > { %p1224_p9 = pnand %p1223_p8, %p1222_p7  ;;  %p1229_p13 = por %p1228_p12, %p1227_p11 }
  0x21   : > { %p1225_p10 = pneg %p1224_p9 }
  0x23   : > { %p1230_p1 = pnand %p1229_p13, %p1225_p10 }
  0x25   : > { %1233 = shalt.err (!%p1230_p1)
}
  0x26   : > { %s1415_s21 = smov 384   ;;  %s1416_s23 = smov 192  }
  0x27   : > { %s1417_s25 = smov 12   ;;  %s1511_s27 = sadd.s32 4294967295, %s1413_s18  }
  0x28   : > { %1168 = dma.hbm_to_vmem [thread:$0]  (!%p1486_p6), %s190_s7, 6144, %s192_s6, %s1494_s8, %s1415_s21, %s1416_s23, %s1417_s25  }
  0x29   : > { %s891_s28 = sadd.s32 4294967294, %s1413_s18   ;;  %p65_p2 = scmp.ne.s32.totalorder %s1405_s16, %s1401_s15 }
  0x2a   : > { %p66_p4 = scmp.eq.s32.totalorder %s1511_s27, 0  ;;  %p141_p5 = scmp.eq.s32.totalorder %s1511_s27, 1 }
  0x2b   : > { %p147_p7 = scmp.eq.s32.totalorder %s891_s28, 1  ;;  %p892_p9 = scmp.ge.s32.totalorder %s1413_s18, 1 }
  0x2c   : > { %p1521_p10 = por %p66_p4, %p65_p2  ;;  %p1528_p11 = por %p141_p5, %p59_p0 }
  0x2d   : > { %p1532_p12 = por %p147_p7, %p65_p2  ;;  %p154_p13 = scmp.lt.s32.totalorder %s1413_s18, 3 }
  0x2e   : > { %s1764_s0 = sld [smem:[#allocation17_spill]]  ;;  %s1144_s11 = smul.u32 3, %s1483_s24 }
  0x2f   : > { %p1540_p1 = pnand %p892_p9, %p154_p13  ;;  %s1418_s12 = smov [#allocation2]  }
  0x30   : > { %s168_s13 = sshll.u32 %s1418_s12, 4  ;;  %s206_s14 = smul.u32 3, %s1413_s18  ;;  %s169_s13 = int_to_ptr.vmem [resolvable:$true] %s168_s13 }
  0x31   : > { %p1161_p0 = pneg %p1540_p1  ;;  %s205_s20 = scalar_lea.vmem [#allocation7], %s1144_s11 }
  0x32   : > { %s213_s21 = sshll.u32 %s205_s20, 4  ;;  %s209_s28 = scalar_lea.hbm %s1751_s2, %s206_s14  ;;  %s214_s21 = int_to_ptr.vmem [resolvable:$true] %s213_s21 }
  0x33   : > { %p1162_p2 = pnand %p1161_p0, %p66_p4  ;;  %s211_s6 = sshll.u32 %s209_s28, 4  ;;  %s212_s6 = int_to_ptr.hbm [resolvable:$true] %s211_s6 }
  0x34   : > { %s166_s9 = sshll.u32 %s1764_s0, 4  ;;  %s1279_s7 = sshra.s32 %s212_s6, 4  ;;  %s167_s9 = int_to_ptr.hbm [resolvable:$true] %s166_s9  ;;  %s1280_s7 = int_to_ptr.hbm [resolvable:$true] %s1279_s7 }
  0x35   : > { %1164 = dma.hbm_to_vmem [thread:$0]  (!%p1162_p2), %s167_s9, 128, %s169_s13, [#allocation3]  }
  0x36   : > { %s1281_s0 = scalar_lea.hbm %s1280_s7, 3  ;;  %s1286_s20 = scalar_lea.hbm %s1751_s2, 6 }
  0x37   : > { %p1282_p5 = scmp.ne.s32.totalorder %s1280_s7, %s1281_s0  ;;  %p1287_p13 = scmp.lt.s32.totalorder %s1280_s7, %s1751_s2 }
  0x38   : > { %p1288_p0 = scmp.lt.s32.totalorder %s1286_s20, %s1281_s0 }
  0x39   : > { %p1284_p7 = pnand %p1282_p5, %p1223_p8 }
  0x3a   : > { %p1289_p2 = por %p1288_p0, %p1287_p13 }
  0x3b   : > { %p1285_p9 = pneg %p1284_p7 }
  0x3d   : > { %p1290_p3 = pnand %p1289_p2, %p1285_p9 }
  0x3f   : > { %1293 = shalt.err (!%p1290_p3)
}
  0x40   : > { %1171 = dma.hbm_to_vmem [thread:$0]  (!%p1486_p6), %s212_s6, 48, %s214_s21, %s1494_s8  }
  0x41   : > { %s228_s23 = scalar_lea.hbm %s1752_s3, %s206_s14  ;;  %s224_s1 = scalar_lea.vmem [#allocation8], %s1144_s11 }
  0x42   : > { %s232_s25 = sshll.u32 %s224_s1, 4  ;;  %s230_s28 = sshll.u32 %s228_s23, 4  ;;  %s233_s25 = int_to_ptr.vmem [resolvable:$true] %s232_s25  ;;  %s231_s28 = int_to_ptr.hbm [resolvable:$true] %s230_s28 }
  0x43   : > { %s221_s17 = scalar_lea.sflag [#allocation9], %s1483_s24  ;;  %s1309_s0 = sshra.s32 %s231_s28, 4  ;;  %s1310_s0 = int_to_ptr.hbm [resolvable:$true] %s1309_s0 }
  0x44   : > { %s1311_s22 = scalar_lea.hbm %s1310_s0, 3  ;;  %s1316_s21 = scalar_lea.hbm %s1752_s3, 6 }
  0x45   : > { %p1312_p3 = scmp.ne.s32.totalorder %s1310_s0, %s1311_s22  ;;  %p1317_p9 = scmp.lt.s32.totalorder %s1310_s0, %s1752_s3 }
  0x46   : > { %p1318_p13 = scmp.lt.s32.totalorder %s1316_s21, %s1311_s22 }
  0x47   : > { %p1314_p5 = pnand %p1312_p3, %p1223_p8 }
  0x48   : > { %p1319_p0 = por %p1318_p13, %p1317_p9 }
  0x49   : > { %p1315_p7 = pneg %p1314_p5 }
  0x4b   : > { %p1320_p2 = pnand %p1319_p0, %p1315_p7 }
  0x4d   : > { %1323 = shalt.err (!%p1320_p2)
}
  0x4e   : > { %1174 = dma.hbm_to_vmem [thread:$0]  (!%p1486_p6), %s231_s28, 48, %s233_s25, %s221_s17  }
  0x4f   : > { %241 = sbr.rel (%p1540_p1) target bundleno = 299 (0x12b), region = 36 }
  0x54   : > { %1384 = dma.done.wait (%p66_p4), [#allocation3], 128  }
  0x55   : > { %1386 = vsyncadd (%p66_p4), [#allocation3], 4294967168  ;;  %s248_s24 = sand.u32 1, %s1511_s27   ;;  %s1588_s11 = sand.u32 1, %s1405_s16  }
  0x56   : > { %s1146_s12 = smul.u32 384, %s1588_s11  ;;  %s249_s20 = scalar_lea.sflag [#allocation6], %s248_s24 }
  0x58   : > { %s1591_s26 = scalar_lea.vmem [#allocation5], %s1146_s12 }
  0x59   : > { %1388 = dma.done.wait (%p1521_p10), %s249_s20, 6192  }
  0x5a   : > { %1390 = vsyncadd (%p1521_p10), %s249_s20, 4294961104  ;;  %s1147_s10 = smul.u32 3, %s1588_s11  ;;  %s269_s13 = scalar_lea.sflag [#allocation9], %s1588_s11 }
  0x5c   : > { %s1598_s9 = scalar_lea.vmem [#allocation7], %s1147_s10  ;;  %s1601_s23 = scalar_lea.vmem [#allocation8], %s1147_s10 }
  0x5d   : > { %1392 = dma.done.wait (%p1521_p10), %s269_s13, 48  }
  0x5e   : > { %1394 = vsyncadd (%p1521_p10), %s269_s13, 4294967248  ;;  %v984_v0 = vld [vmem:[%s1591_s26 + $0xa8] sm:$0xf]  ;;  %v1116_v1 = vld [vmem:[%s1591_s26 + $0xb0] sm:$0xf0]  ;;  %s1148_s29 = smul.u32 24, %s1588_s11 }
  0x5f   : > { %v1080_v2 = vld [vmem:[%s1591_s26 + $0x168] sm:$0xf]  ;;  %v985_v3 = vor.u32 %v1116_v1, %v984_v0  ;;  %v1140_v4 = vld [vmem:[%s1591_s26 + $0x170] sm:$0xf0]  ;;  %v972_v5 = vld [vmem:[%s1591_s26 + $0x90] sm:$0xf] }
  0x60   : > { %v1113_v6 = vld [vmem:[%s1591_s26 + $0x98] sm:$0xf0]  ;;  %v1081_v7 = vor.u32 %v1140_v4, %v1080_v2  ;;  %v1068_v8 = vld [vmem:[%s1591_s26 + $0x150] sm:$0xf]  ;;  %v1115_v10 = vld [vmem:[%s1591_s26 + $0xac] sm:$0xf] }
  0x61   : > { %v1137_v9 = vld [vmem:[%s1591_s26 + $0x158] sm:$0xf0]  ;;  %652 = vmatpush.bf16.msra.mxu0 %v985_v3  ;;  %v973_v11 = vor.u32 %v1113_v6, %v972_v5  ;;  %v986_v12 = vld [vmem:[%s1591_s26 + $0xb4] sm:$0xf0]  ;;  %v1110_v14 = vld [vmem:[%s1591_s26 + $0x80] sm:$0xf0] }
  0x62   : > { %v960_v13 = vld [vmem:[%s1591_s26 + $0x78] sm:$0xf]  ;;  %665 = vmatpush.bf16.msra.mxu1 %v1081_v7  ;;  %v1069_v15 = vor.u32 %v1137_v9, %v1068_v8  ;;  %v989_v16 = vor.u32 %v1115_v10, %v986_v12  ;;  %v1134_v18 = vld [vmem:[%s1591_s26 + $0x140] sm:$0xf0]  ;;  %v1139_v19 = vld [vmem:[%s1591_s26 + $0x16c] sm:$0xf] }
  0x63   : > { %v1056_v17 = vld [vmem:[%s1591_s26 + $0x138] sm:$0xf]  ;;  %v1112_v21 = vld [vmem:[%s1591_s26 + $0x94] sm:$0xf]  ;;  %v974_v22 = vld [vmem:[%s1591_s26 + $0x9c] sm:$0xf0]  ;;  %v961_v25 = vor.u32 %v1110_v14, %v960_v13 }
  0x64   : > { %v1082_v20 = vld [vmem:[%s1591_s26 + $0x174] sm:$0xf0]  ;;  %678 = vmatpush.bf16.msra.mxu2 %v989_v16  ;;  %v977_v24 = vor.u32 %v1112_v21, %v974_v22  ;;  %v948_v26 = vld [vmem:[%s1591_s26 + $0x60] sm:$0xf]  ;;  %v1136_v27 = vld [vmem:[%s1591_s26 + $0x154] sm:$0xf]  ;;  %v1057_v29 = vor.u32 %v1134_v18, %v1056_v17 }
  0x65   : > { %v1085_v23 = vor.u32 %v1139_v19, %v1082_v20  ;;  %653 = vmatpush.bf16.msra.mxu0 %v973_v11  ;;  %v1070_v28 = vld [vmem:[%s1591_s26 + $0x15c] sm:$0xf0]  ;;  %v1107_v30 = vld [vmem:[%s1591_s26 + $0x68] sm:$0xf0]  ;;  %v1109_v32 = vld [vmem:[%s1591_s26 + $0x7c] sm:$0xf] }
  0x66   : > { %666 = vmatpush.bf16.msra.mxu1 %v1069_v15  ;;  %v1073_v31 = vor.u32 %v1136_v27, %v1070_v28  ;;  %v962_v33 = vld [vmem:[%s1591_s26 + $0x84] sm:$0xf0]  ;;  %v1044_v34 = vld [vmem:[%s1591_s26 + $0x120] sm:$0xf]  ;;  %v1131_v35 = vld [vmem:[%s1591_s26 + $0x128] sm:$0xf0]  ;;  %v949_v39 = vor.u32 %v1107_v30, %v948_v26 }
  0x67   : > { %691 = vmatpush.bf16.msra.mxu3 %v1085_v23  ;;  %v965_v36 = vor.u32 %v1109_v32, %v962_v33  ;;  %v1133_v37 = vld [vmem:[%s1591_s26 + $0x13c] sm:$0xf]  ;;  %v1058_v38 = vld [vmem:[%s1591_s26 + $0x144] sm:$0xf0]  ;;  %v1106_v40 = vld [vmem:[%s1591_s26 + $0x64] sm:$0xf]  ;;  %v1045_v42 = vor.u32 %v1131_v35, %v1044_v34 }
  0x68   : > { %679 = vmatpush.bf16.msra.mxu2 %v977_v24  ;;  %v950_v41 = vld [vmem:[%s1591_s26 + $0x6c] sm:$0xf0]  ;;  %v936_v43 = vld [vmem:[%s1591_s26 + $0x48] sm:$0xf]  ;;  %v1104_v44 = vld [vmem:[%s1591_s26 + $0x50] sm:$0xf0]  ;;  %v1061_v46 = vor.u32 %v1133_v37, %v1058_v38 }
  0x69   : > { %654 = vmatpush.bf16.msra.mxu0 %v961_v25  ;;  %v1032_v45 = vld [vmem:[%s1591_s26 + $0x108] sm:$0xf]  ;;  %v1128_v47 = vld [vmem:[%s1591_s26 + $0x110] sm:$0xf0]  ;;  %v1130_v48 = vld [vmem:[%s1591_s26 + $0x124] sm:$0xf]  ;;  %v953_v50 = vor.u32 %v1106_v40, %v950_v41  ;;  %v937_v51 = vor.u32 %v1104_v44, %v936_v43 }
  0x6a   : > { %667 = vmatpush.bf16.msra.mxu1 %v1057_v29  ;;  %v1046_v49 = vld [vmem:[%s1591_s26 + $0x12c] sm:$0xf0]  ;;  %v1103_v52 = vld [vmem:[%s1591_s26 + $0x4c] sm:$0xf]  ;;  %v938_v53 = vld [vmem:[%s1591_s26 + $0x54] sm:$0xf0]  ;;  %v1033_v54 = vor.u32 %v1128_v47, %v1032_v45 }
  0x6b   : > { %692 = vmatpush.bf16.msra.mxu3 %v1073_v31  ;;  %v924_v55 = vld [vmem:[%s1591_s26 + $0x30] sm:$0xf]  ;;  %v1101_v56 = vld [vmem:[%s1591_s26 + $0x38] sm:$0xf0]  ;;  %v1049_v58 = vor.u32 %v1130_v48, %v1046_v49  ;;  %v1127_v60 = vld [vmem:[%s1591_s26 + $0x10c] sm:$0xf]  ;;  %v941_v62 = vor.u32 %v1103_v52, %v938_v53 }
  0x6c   : > { %680 = vmatpush.bf16.msra.mxu2 %v965_v36  ;;  %v1020_v57 = vld [vmem:[%s1591_s26 + $0xf0] sm:$0xf]  ;;  %v1125_v59 = vld [vmem:[%s1591_s26 + $0xf8] sm:$0xf0]  ;;  %v1034_v61 = vld [vmem:[%s1591_s26 + $0x114] sm:$0xf0]  ;;  %v925_v63 = vor.u32 %v1101_v56, %v924_v55 }
  0x6d   : > { %655 = vmatpush.bf16.msra.mxu0 %v949_v39  ;;  %v1100_v0 = vld [vmem:[%s1591_s26 + $0x34] sm:$0xf]  ;;  %v926_v1 = vld [vmem:[%s1591_s26 + $0x3c] sm:$0xf0]  ;;  %v1021_v2 = vor.u32 %v1125_v59, %v1020_v57  ;;  %v912_v3 = vld [vmem:[%s1591_s26 + $0x18] sm:$0xf]  ;;  %v1037_v6 = vor.u32 %v1127_v60, %v1034_v61 }
  0x6e   : > { %668 = vmatpush.bf16.msra.mxu1 %v1045_v42  ;;  %v1098_v4 = vld [vmem:[%s1591_s26 + $0x20] sm:$0xf0]  ;;  %v1008_v5 = vld [vmem:[%s1591_s26 + $0xd8] sm:$0xf]  ;;  %v1124_v8 = vld [vmem:[%s1591_s26 + $0xf4] sm:$0xf]  ;;  %v929_v10 = vor.u32 %v1100_v0, %v926_v1 }
  0x6f   : > { %693 = vmatpush.bf16.msra.mxu3 %v1061_v46  ;;  %v1122_v7 = vld [vmem:[%s1591_s26 + $0xe0] sm:$0xf0]  ;;  %v1022_v9 = vld [vmem:[%s1591_s26 + $0xfc] sm:$0xf0]  ;;  %v913_v12 = vor.u32 %v1098_v4, %v912_v3  ;;  %v1097_v13 = vld [vmem:[%s1591_s26 + $0x1c] sm:$0xf] }
  0x70   : > { %681 = vmatpush.bf16.msra.mxu2 %v953_v50  ;;  %v900_v11 = vld [vmem:[%s1591_s26] sm:$0xf]  ;;  %v914_v14 = vld [vmem:[%s1591_s26 + $0x24] sm:$0xf0]  ;;  %v312_v15 = vld [vmem:[#allocation2] sm:$0xff]  ;;  %v1009_v16 = vor.u32 %v1122_v7, %v1008_v5  ;;  %v1025_v20 = vor.u32 %v1124_v8, %v1022_v9  ;;  %s307_s1 = scalar_lea.vmem [#allocation10], %s1148_s29 }
  0x71   : > { %656 = vmatpush.bf16.msra.mxu0 %v937_v51  ;;  %v1095_v17 = vld [vmem:[%s1591_s26 + $0x8] sm:$0xf0]  ;;  %v996_v18 = vld [vmem:[%s1591_s26 + $0xc0] sm:$0xf]  ;;  %v992_v21 = vld [vmem:[%s1591_s26 + $0xb0] sm:$0xf]  ;;  %v917_v25 = vor.u32 %v1097_v13, %v914_v14  ;;  %v390_v28 = vunpack.c.l.b16 %v312_v15  ;;  %v391_v32 = vunpack.c.h.b16 %v312_v15 }
  0x72   : > { %669 = vmatpush.bf16.msra.mxu1 %v1033_v54  ;;  %v1119_v19 = vld [vmem:[%s1591_s26 + $0xc8] sm:$0xf0]  ;;  %v1117_v22 = vld [vmem:[%s1591_s26 + $0xb8] sm:$0xf0]  ;;  %v1088_v23 = vld [vmem:[%s1591_s26 + $0x170] sm:$0xf]  ;;  %v901_v29 = vor.u32 %v1095_v17, %v900_v11 }
  0x73   : > { %694 = vmatpush.bf16.msra.mxu3 %v1049_v58  ;;  %v1141_v24 = vld [vmem:[%s1591_s26 + $0x178] sm:$0xf0]  ;;  %v1010_v27 = vld [vmem:[%s1591_s26 + $0xe4] sm:$0xf0]  ;;  %v1094_v30 = vld [vmem:[%s1591_s26 + $0x4] sm:$0xf]  ;;  %v997_v33 = vor.u32 %v1119_v19, %v996_v18  ;;  %v993_v34 = vor.u32 %v1117_v22, %v992_v21  ;;  %v1677_v42 = vpack.c.b16 %v390_v28, %v390_v28  ;;  %v1681_v45 = vpack.c.b16 %v391_v32, %v391_v32 }
  0x74   : > { %682 = vmatpush.bf16.msra.mxu2 %v941_v62  ;;  %v1121_v26 = vld [vmem:[%s1591_s26 + $0xdc] sm:$0xf]  ;;  %v902_v31 = vld [vmem:[%s1591_s26 + $0xc] sm:$0xf0]  ;;  %v1089_v35 = vor.u32 %v1141_v24, %v1088_v23  ;;  %v980_v37 = vld [vmem:[%s1591_s26 + $0x98] sm:$0xf] }
  0x75   : > { %657 = vmatpush.bf16.msra.mxu0 %v925_v63  ;;  %v1013_v36 = vor.u32 %v1121_v26, %v1010_v27  ;;  %v1114_v38 = vld [vmem:[%s1591_s26 + $0xa0] sm:$0xf0]  ;;  %v1076_v39 = vld [vmem:[%s1591_s26 + $0x158] sm:$0xf]  ;;  %v905_v41 = vor.u32 %v1094_v30, %v902_v31  ;;  %v998_v44 = vld [vmem:[%s1591_s26 + $0xcc] sm:$0xf0] }
  0x76   : > { %670 = vmatpush.bf16.msra.mxu1 %v1021_v2  ;;  %v1138_v40 = vld [vmem:[%s1591_s26 + $0x160] sm:$0xf0]  ;;  %v981_v46 = vor.u32 %v1114_v38, %v980_v37  ;;  %v968_v49 = vld [vmem:[%s1591_s26 + $0x80] sm:$0xf]  ;;  %v1111_v50 = vld [vmem:[%s1591_s26 + $0x88] sm:$0xf0] }
  0x77   : > { %695 = vmatpush.bf16.msra.mxu3 %v1037_v6  ;;  %v1118_v43 = vld [vmem:[%s1591_s26 + $0xc4] sm:$0xf]  ;;  %v1077_v47 = vor.u32 %v1138_v40, %v1076_v39  ;;  %v1064_v51 = vld [vmem:[%s1591_s26 + $0x140] sm:$0xf]  ;;  %v1135_v52 = vld [vmem:[%s1591_s26 + $0x148] sm:$0xf0]  ;;  %v969_v53 = vor.u32 %v1111_v50, %v968_v49 }
  0x78   : > { %683 = vmatpush.bf16.msra.mxu2 %v929_v10  ;;  %v1001_v48 = vor.u32 %v1118_v43, %v998_v44  ;;  %v1065_v54 = vor.u32 %v1135_v52, %v1064_v51  ;;  %v956_v55 = vld [vmem:[%s1591_s26 + $0x68] sm:$0xf]  ;;  %v1108_v56 = vld [vmem:[%s1591_s26 + $0x70] sm:$0xf0]  ;;  %v944_v61 = vld [vmem:[%s1591_s26 + $0x50] sm:$0xf] }
  0x79   : > { %658 = vmatpush.bf16.msra.mxu0 %v913_v12  ;;  %v1052_v57 = vld [vmem:[%s1591_s26 + $0x128] sm:$0xf]  ;;  %v1132_v58 = vld [vmem:[%s1591_s26 + $0x130] sm:$0xf0]  ;;  %v957_v59 = vor.u32 %v1108_v56, %v956_v55  ;;  %v1105_v62 = vld [vmem:[%s1591_s26 + $0x58] sm:$0xf0] }
  0x7a   : > { %671 = vmatpush.bf16.msra.mxu1 %v1009_v16  ;;  %v1053_v60 = vor.u32 %v1132_v58, %v1052_v57  ;;  %v1040_v63 = vld [vmem:[%s1591_s26 + $0x110] sm:$0xf]  ;;  %v1129_v0 = vld [vmem:[%s1591_s26 + $0x118] sm:$0xf0]  ;;  %v945_v1 = vor.u32 %v1105_v62, %v944_v61  ;;  %v932_v3 = vld [vmem:[%s1591_s26 + $0x38] sm:$0xf] }
  0x7b   : > { %696 = vmatpush.bf16.msra.mxu3 %v1025_v20  ;;  %v1041_v2 = vor.u32 %v1129_v0, %v1040_v63  ;;  %v1102_v4 = vld [vmem:[%s1591_s26 + $0x40] sm:$0xf0]  ;;  %v1028_v5 = vld [vmem:[%s1591_s26 + $0xf8] sm:$0xf]  ;;  %v920_v9 = vld [vmem:[%s1591_s26 + $0x20] sm:$0xf] }
  0x7c   : > { %684 = vmatpush.bf16.msra.mxu2 %v917_v25  ;;  %v1126_v6 = vld [vmem:[%s1591_s26 + $0x100] sm:$0xf0]  ;;  %v933_v7 = vor.u32 %v1102_v4, %v932_v3  ;;  %v1099_v10 = vld [vmem:[%s1591_s26 + $0x28] sm:$0xf0]  ;;  %v1016_v11 = vld [vmem:[%s1591_s26 + $0xe0] sm:$0xf] }
  0x7d   : > { %659 = vmatpush.bf16.msra.mxu0 %v901_v29  ;;  %v1029_v8 = vor.u32 %v1126_v6, %v1028_v5  ;;  %v1123_v12 = vld [vmem:[%s1591_s26 + $0xe8] sm:$0xf0]  ;;  %v921_v13 = vor.u32 %v1099_v10, %v920_v9  ;;  %v908_v15 = vld [vmem:[%s1591_s26 + $0x8] sm:$0xf]  ;;  %v1096_v16 = vld [vmem:[%s1591_s26 + $0x10] sm:$0xf0] }
  0x7e   : > { %672 = vmatpush.bf16.msra.mxu1 %v997_v33  ;;  %v1017_v14 = vor.u32 %v1123_v12, %v1016_v11  ;;  %v1004_v17 = vld [vmem:[%s1591_s26 + $0xc8] sm:$0xf]  ;;  %v1120_v18 = vld [vmem:[%s1591_s26 + $0xd0] sm:$0xf0]  ;;  %v909_v19 = vor.u32 %v1096_v16, %v908_v15  ;;  %v377_v21 = vld [vmem:[%s1598_s9] sm:$0x7] }
  0x7f   : > { %697 = vmatpush.bf16.msra.mxu3 %v1013_v36  ;;  %v1005_v20 = vor.u32 %v1120_v18, %v1004_v17  ;;  %v378_v22 = vunpack.c.l.bf16 %v377_v21  ;;  %v735_v36 = vld [vmem:[%s1601_s23] sm:$0x7]  ;;  %s1142_s25 = smul.u32 24, %s1511_s27  ;;  %s763_s22 = sshll.u32 %s307_s1, 4  ;;  %s764_s22 = int_to_ptr.vmem [resolvable:$true] %s763_s22 }
  0x80   : > { %685 = vmatpush.bf16.msra.mxu2 %v905_v41  ;;  %660 = vmatmul.bf16.vlgmr.msra.gmra.mxu0 %v1677_v42  ;;  %v737_v39 = vperm.slane %v735_v36, 0  ;;  %v738_v40 = vperm.slane %v735_v36, 1  ;;  %s750_s27 = scalar_lea.sflag [#allocation4], %s1588_s11  ;;  %s1359_s24 = scalar_lea.hbm %s1753_s4, 48 }
  0x81   : > { %704 = vmatpush.bf16.msrb.mxu0 %v993_v34  ;;  %673 = vmatmul.bf16.vlgmr.msra.gmra.mxu1 %v1681_v45  ;;  %v380_v23 = vperm.slane %v378_v22, 0  ;;  %v381_v27 = vperm.slane %v378_v22, 2  ;;  %s761_s0 = scalar_lea.hbm %s1753_s4, %s1142_s25 }
  0x82   : > { %717 = vmatpush.bf16.msrb.mxu1 %v1089_v35  ;;  %s765_s7 = sshll.u32 %s761_s0, 4  ;;  %s766_s7 = int_to_ptr.hbm [resolvable:$true] %s765_s7 }
  0x83   : > { %698 = vmatpush.bf16.msra.mxu3 %v1001_v48  ;;  %686 = vmatmul.bf16.vlgmr.msra.gmra.mxu2 %v1677_v42  ;;  %v386_v26 = vperm.slane %v380_v23, 0  ;;  %v387_v29 = vperm.slane %v381_v27, 0  ;;  %s1353_s8 = sshra.s32 %s766_s7, 4  ;;  %s1354_s8 = int_to_ptr.hbm [resolvable:$true] %s1353_s8 }
  0x84   : > { %s1355_s21 = scalar_lea.hbm %s1354_s8, 24  ;;  %p1360_p10 = scmp.lt.s32.totalorder %s1354_s8, %s1753_s4 }
  0x85   : > { %705 = vmatpush.bf16.msrb.mxu0 %v981_v46  ;;  %p1356_p6 = scmp.ne.s32.totalorder %s1354_s8, %s1355_s21  ;;  %p1361_p1 = scmp.lt.s32.totalorder %s1359_s24, %s1355_s21 }
  0x86   : > { %718 = vmatpush.bf16.msrb.mxu1 %v1077_v47  ;;  %699 = vmatmul.bf16.vlgmr.msra.gmra.mxu3 %v1681_v45  ;;  %v382_v47 = vperm.slane %v378_v22, 4 }
  0x87   : > { %p1357_p8 = pnand %p1356_p6, %p1528_p11  ;;  %p1362_p3 = por %p1361_p1, %p1360_p10 }
  0x88   : > { %v388_v48 = vperm.slane %v382_v47, 0 }
  0x89   : > { %706 = vmatpush.bf16.msrb.mxu0 %v969_v53  ;;  %p1358_p4 = pneg %p1357_p8 }
  0x8a   : > { %719 = vmatpush.bf16.msrb.mxu1 %v1065_v54  ;;  %v739_v54 = vperm.slane %v735_v36, 2 }
  0x8b   : > { %p1363_p5 = pnand %p1362_p3, %p1358_p4 }
  0x8d   : > { %707 = vmatpush.bf16.msrb.mxu0 %v957_v59 }
  0x8e   : > { %720 = vmatpush.bf16.msrb.mxu1 %v1053_v60 }
  0x91   : > { %708 = vmatpush.bf16.msrb.mxu0 %v945_v1 }
  0x92   : > { %721 = vmatpush.bf16.msrb.mxu1 %v1041_v2 }
  0x95   : > { %709 = vmatpush.bf16.msrb.mxu0 %v933_v7 }
  0x96   : > { %722 = vmatpush.bf16.msrb.mxu1 %v1029_v8 }
  0x99   : > { %710 = vmatpush.bf16.msrb.mxu0 %v921_v13 }
  0x9a   : > { %723 = vmatpush.bf16.msrb.mxu1 %v1017_v14 }
  0x9d   : > { %711 = vmatpush.bf16.msrb.mxu0 %v909_v19 }
  0x9e   : > { %724 = vmatpush.bf16.msrb.mxu1 %v1005_v20 }
  0xa0   : > { %712 = vmatmul.bf16.vlgmr.msrb.gmra.mxu0 %v1677_v42 }
  0xa1   : > { %725 = vmatmul.bf16.vlgmr.msrb.gmra.mxu1 %v1681_v45 }
  0xfd   : > { %v661_v24 = vpop.f32.mrf.mxu0 }
  0xfe   : > { %v674_v25 = vpop.f32.mrf.mxu1  ;;  %v662_v28 = vadd.f32 %v661_v24, %v386_v26 }
 0x100   : > { %v675_v33 = vadd.f32 %v674_v25, %v662_v28 }
 0x105   : > { %v663_v30 = vpop.f32.mrf.mxu0 }
 0x106   : > { %v676_v31 = vpop.f32.mrf.mxu1  ;;  %v687_v32 = vpop.f32.mrf.mxu2 }
 0x107   : > { %v688_v34 = vadd.f32 %v687_v32, %v387_v29 }
 0x109   : > { %v700_v35 = vpop.f32.mrf.mxu3 }
 0x10a   : > { %v701_v37 = vadd.f32 %v700_v35, %v688_v34 }
 0x10c   : > { %v730_v38 = vpack.c.bf16 %v701_v37, %v675_v33 }
 0x10e   : > { %v732_v41 = vunpack.c.l.bf16 %v730_v38  ;;  %v733_v42 = vunpack.c.h.bf16 %v730_v38  ;;  %v689_v43 = vpop.f32.mrf.mxu2 }
 0x110   : > { %v743_v44 = vadd.f32 %v737_v39, %v732_v41  ;;  %v744_v45 = vadd.f32 %v738_v40, %v733_v42 }
 0x111   : > { %v702_v46 = vpop.f32.mrf.mxu3 }
 0x112   : > { %746 = vst [vmem:[%s307_s1] sm:$0xff] %v743_v44 }
 0x113   : > { %747 = vst [vmem:[%s307_s1 + $0x8] sm:$0xff] %v744_v45 }
 0x11d   : > { %v713_v49 = vpop.f32.mrf.mxu0 }
 0x11e   : > { %v714_v50 = vadd.f32 %v713_v49, %v388_v48  ;;  %v726_v51 = vpop.f32.mrf.mxu1 }
 0x120   : > { %v727_v52 = vadd.f32 %v726_v51, %v714_v50 }
 0x122   : > { %v731_v53 = vpack.c.bf16 %v727_v52, %v727_v52 }
 0x124   : > { %v734_v55 = vunpack.c.l.bf16 %v731_v53 }
 0x125   : > { %v715_v56 = vpop.f32.mrf.mxu0 }
 0x126   : > { %v745_v57 = vadd.f32 %v739_v54, %v734_v55  ;;  %v728_v58 = vpop.f32.mrf.mxu1 }
 0x128   : > { %748 = vst [vmem:[%s307_s1 + $0x10] sm:$0xff] %v745_v57 }
 0x129   : > { %1366 = shalt.err (!%p1363_p5)
}
 0x12a   : > { %1159 = dma.vmem_to_hbm [thread:$0]  (%p1528_p11), %s764_s22, 384, %s766_s7, %s750_s27  }
 0x12b PF: > { %s777_s11 = sand.u32 1, %s1401_s15   ;;  %p1766_p7 = scmp.ge.s32.totalorder %s1413_s18, 2 }
 0x12c   : > { %s778_s26 = scalar_lea.sflag [#allocation4], %s777_s11 }
 0x12d   : > { %p1176_p9 = pnand %p1766_p7, %p1532_p12 }
 0x12f   : > { %p1177_p13 = pneg %p1176_p9 }
 0x131   : > { %1396 = dma.done.wait (%p1177_p13), %s778_s26, 384  }
 0x132   : > { %1398 = vsyncadd (%p1177_p13), %s778_s26, 4294966912  ;;  %s1767_s10 = sld [smem:[#allocation15_spill]]  ;;  %p21_p0 = scmp.ge.s32.totalorder %s1465_s19, 4  }
 0x133   : > { %s1768_s17 = sld [smem:[#allocation16_spill]]  ;;  %s1769_s15 = smov %s1405_s16 }
 0x134   : > { %s1771_s18 = smov %s1465_s19  ;;  %23 = sbr.rel (!%p21_p0) target bundleno = 11 (0xb), region = 110 }
 0x138   : > { %s1770_s16 = smov %s1767_s10 }
 0x139   :  { %784 = vsyncpa [#allocation3], 1 }
 0x13a   :  { %786 = vsyncpa [#allocation3 + $0x1], 1 }
 0x13b   :  { %787 = vsyncpa [#allocation6], 1 }
 0x13c   :  { %789 = vsyncpa [#allocation6 + $0x1], 1 }
 0x13d   :  { %790 = vsyncpa [#allocation9], 1 }
 0x13e   :  { %792 = vsyncpa [#allocation9 + $0x1], 1 }
 0x13f   :  { %793 = vsyncpa [#allocation4], 1 }
 0x140   :  { %795 = vsyncpa [#allocation4 + $0x1], 1 }

</bundles_post_ra>
